<compile_context>
chip_gen: v7x
topology: tpu7x:2x2x1
jax: 0.10.0
libtpu: 0.0.40
codegen_flags: <defaults>
</compile_context>

<pallas_src>
import jax
import jax.numpy as jnp
from jax.experimental import pallas as pl
from jax.experimental.pallas import tpu as pltpu


def _se_block_kernel(x_ref, w1a_ref, w1m_ref, w2_ref, o_ref):
    """One (bt, C, HW) block of batch rows per grid step.

    x_ref   : (bt, C, HW)  streaming dtype (f32 or bf16)
    w1a_ref : (C, Cr)      f32  first Linear, avg-pool half (pre-transposed)
    w1m_ref : (C, Cr)      f32  first Linear, max-pool half (pre-transposed)
    w2_ref  : (Cr, C)      f32  second Linear (pre-transposed)
    o_ref   : (bt, C, HW)  streaming dtype
    """
    x = x_ref[...]                                   # (bt, C, HW)
    inv_hw = 1.0 / x.shape[-1]                       # block covers the full HW

    # Squeeze: adaptive avg pool (f32 accumulation, no full-slab f32 upcast)
    # and adaptive max pool (exact in the streaming dtype).
    avg_y = jnp.sum(x, axis=-1, dtype=jnp.float32) * inv_hw      # (bt, C) f32
    max_y = jnp.max(x, axis=-1).astype(jnp.float32)              # (bt, C) f32

    # fc[0]: Linear(2C -> Cr, bias=False) on concat([avg, max]).
    # concat([a, m]) @ W1^T == a @ W1a + m @ W1m (weight split in the wrapper),
    # avoiding an in-kernel lane concatenate. These tiny dots hide under DMA.
    h = jnp.dot(avg_y, w1a_ref[...], preferred_element_type=jnp.float32)
    h = h + jnp.dot(max_y, w1m_ref[...], preferred_element_type=jnp.float32)

    # fc[1]: ReLU
    h = jnp.maximum(h, 0.0)

    # fc[2]: Linear(Cr -> C, bias=False)
    s = jnp.dot(h, w2_ref[...], preferred_element_type=jnp.float32)

    # fc[3]: Sigmoid on a (bt, C) tensor -- negligible, exp goes to the EUP.
    gate = jax.nn.sigmoid(s)                                     # (bt, C) f32

    # Excite: broadcast gate over spatial, scale in the streaming dtype so no
    # full-slab f32 temporary is materialized.
    o_ref[...] = x * gate.astype(x.dtype)[:, :, None]


def se_block(x_nchw, w1, w2):
    """SEBlock forward.

    x_nchw : (B, C, H, W)    activation (f32 or bf16; dtype is preserved)
    w1     : (Cr, 2C)        torch Linear(channel*2, channel//reduction) weight
    w2     : (C, Cr)         torch Linear(channel//reduction, channel) weight
    """
    b, c, h, w = x_nchw.shape
    hw = h * w
    dtype = x_nchw.dtype
    itemsize = jnp.dtype(dtype).itemsize
    cr = w1.shape[0]

    x3 = x_nchw.reshape(b, c, hw)                    # no padding, no extra HBM pass

    # Torch Linear computes y @ W.T; pre-transpose and split the first-layer
    # weight into the avg half (rows 0:C of W1^T) and the max half (rows C:2C).
    w1_t = jnp.transpose(w1).astype(jnp.float32)     # (2C, Cr)
    w1a = w1_t[:c, :]                                # (C, Cr)
    w1m = w1_t[c:, :]                                # (C, Cr)
    w2_t = jnp.transpose(w2).astype(jnp.float32)     # (Cr, C)

    # --- block sizing ---------------------------------------------------
    # Largest divisor of B whose double-buffered in+out footprint fits a
    # conservative VMEM budget (safe on v5e/v6e/v7x); amortizes per-grid-step
    # overhead when per-row blocks are tiny (deep SE layers).
    bytes_per_row = 2 * c * hw * itemsize            # one input + one output row
    io_budget = 28 * 1024 * 1024                     # for the 2x-buffered IO blocks
    bt = 1
    for cand in range(1, b + 1):
        if b % cand == 0 and 2 * cand * bytes_per_row <= io_budget:
            bt = cand

    weight_bytes = (2 * c * cr + cr * c) * 4
    vmem_needed = 2 * bt * bytes_per_row + 2 * weight_bytes + (4 << 20)  # + slack
    vmem_limit = int(min(100 << 20, max(vmem_needed, 8 << 20)))

    grid = (b // bt,)

    cost = pl.CostEstimate(
        flops=int(2 * b * c * hw + 2 * b * (2 * c * cr + cr * c)),
        transcendentals=int(b * c),
        bytes_accessed=int(2 * b * c * hw * itemsize + 3 * weight_bytes),
    )

    out = pl.pallas_call(
        _se_block_kernel,
        out_shape=jax.ShapeDtypeStruct((b, c, hw), dtype),
        grid=grid,
        in_specs=[
            pl.BlockSpec((bt, c, hw), lambda i: (i, 0, 0)),   # x: bt batch rows
            pl.BlockSpec((c, cr), lambda i: (0, 0)),          # w1a: resident
            pl.BlockSpec((c, cr), lambda i: (0, 0)),          # w1m: resident
            pl.BlockSpec((cr, c), lambda i: (0, 0)),          # w2 : resident
        ],
        out_specs=pl.BlockSpec((bt, c, hw), lambda i: (i, 0, 0)),
        compiler_params=pltpu.CompilerParams(
            dimension_semantics=("parallel",),       # shard batch across TCs (v7x)
            vmem_limit_bytes=vmem_limit,
        ),
        cost_estimate=cost,
    )(x3, w1a, w1m, w2_t)

    return out.reshape(b, c, h, w)


if __name__ == "__main__":
    # Module hyper-params (reduction=8 needs channel >= 8 for a non-empty bottleneck).
    B, C, H, W = 2, 16, 8, 8
    reduction = 8
    Cr = C // reduction

    key = jax.random.PRNGKey(0)
    kx, k1, k2 = jax.random.split(key, 3)

    x = jax.random.normal(kx, (B, C, H, W), dtype=jnp.float32)
    # Deterministic synthetic weights in torch Linear layout: (out_features, in_features).
    w1 = jax.random.normal(k1, (Cr, 2 * C), dtype=jnp.float32) * 0.1   # Linear(2C -> Cr)
    w2 = jax.random.normal(k2, (C, Cr), dtype=jnp.float32) * 0.1       # Linear(Cr -> C)

    y = se_block(x, w1, w2)
    jax.block_until_ready(y)

    # Pure-JAX reference check of the same forward semantics.
    avg_y = jnp.mean(x, axis=(2, 3))
    max_y = jnp.max(x, axis=(2, 3))
    cat = jnp.concatenate([avg_y, max_y], axis=1)
    hid = jnp.maximum(cat @ w1.T, 0.0)
    gate = jax.nn.sigmoid(hid @ w2.T)
    ref = x * gate[:, :, None, None]

    assert y.shape == (B, C, H, W)
    assert jnp.allclose(y, ref, atol=1e-5, rtol=1e-5), float(jnp.max(jnp.abs(y - ref)))

    print("KERNEL_OK")
</pallas_src>

<mosaic_0001>
module attributes {stable_mosaic.version = 11 : i64} {
  func.func @_se_block_kernel(%arg0: i32, %arg1: memref<2x16x64xf32, #tpu.memory_space<vmem>>, %arg2: memref<16x2xf32, #tpu.memory_space<vmem>>, %arg3: memref<16x2xf32, #tpu.memory_space<vmem>>, %arg4: memref<2x16xf32, #tpu.memory_space<vmem>>, %arg5: memref<2x16x64xf32, #tpu.memory_space<vmem>>) attributes {dimension_semantics = [#tpu.dimension_semantics<parallel>], iteration_bounds = array<i64: 1>, scalar_prefetch = 0 : i64, scratch_operands = 0 : i64, tpu.core_type = #tpu.core_type<tc>, window_params = [{transform_indices = @transform_0, window_bounds = array<i64: 2, 16, 64>}, {pipeline_mode = #tpu.pipeline_mode<synchronous>, transform_indices = @transform_1, window_bounds = array<i64: 16, 2>}, {pipeline_mode = #tpu.pipeline_mode<synchronous>, transform_indices = @transform_2, window_bounds = array<i64: 16, 2>}, {pipeline_mode = #tpu.pipeline_mode<synchronous>, transform_indices = @transform_3, window_bounds = array<i64: 2, 16>}, {transform_indices = @transform_4, window_bounds = array<i64: 2, 16, 64>}]} {
    %c0 = arith.constant 0 : index
    %c0_0 = arith.constant 0 : index
    %c0_1 = arith.constant 0 : index
    %0 = vector.load %arg1[%c0, %c0_0, %c0_1] : memref<2x16x64xf32, #tpu.memory_space<vmem>>, vector<2x16x64xf32>
    %cst = arith.constant dense<0.000000e+00> : vector<2x16xf32>
    %1 = vector.multi_reduction <add>, %0, %cst [2] : vector<2x16x64xf32> to vector<2x16xf32>
    %cst_2 = arith.constant 1.562500e-02 : f32
    %2 = vector.broadcast %cst_2 : f32 to vector<2x16xf32>
    %3 = arith.mulf %1, %2 : vector<2x16xf32>
    %cst_3 = arith.constant dense<0xFF800000> : vector<2x16xf32>
    %4 = vector.multi_reduction <maximumf>, %0, %cst_3 [2] : vector<2x16x64xf32> to vector<2x16xf32>
    %c0_4 = arith.constant 0 : index
    %c0_5 = arith.constant 0 : index
    %5 = vector.load %arg2[%c0_4, %c0_5] : memref<16x2xf32, #tpu.memory_space<vmem>>, vector<16x2xf32>
    %cst_6 = arith.constant dense<0.000000e+00> : vector<2x2xf32>
    %6 = tpu.matmul %3, %5, %cst_6 {dimension_numbers = #tpu.dot_dimension_numbers<[1], [0], [0], [1], [0, 0, 1, 1], [], []>} : vector<2x16xf32>, vector<16x2xf32>, vector<2x2xf32> -> vector<2x2xf32>
    %c0_7 = arith.constant 0 : index
    %c0_8 = arith.constant 0 : index
    %7 = vector.load %arg3[%c0_7, %c0_8] : memref<16x2xf32, #tpu.memory_space<vmem>>, vector<16x2xf32>
    %cst_9 = arith.constant dense<0.000000e+00> : vector<2x2xf32>
    %8 = tpu.matmul %4, %7, %cst_9 {dimension_numbers = #tpu.dot_dimension_numbers<[1], [0], [0], [1], [0, 0, 1, 1], [], []>} : vector<2x16xf32>, vector<16x2xf32>, vector<2x2xf32> -> vector<2x2xf32>
    %9 = arith.addf %6, %8 : vector<2x2xf32>
    %cst_10 = arith.constant 0.000000e+00 : f32
    %10 = vector.broadcast %cst_10 : f32 to vector<2x2xf32>
    %11 = arith.maximumf %9, %10 : vector<2x2xf32>
    %c0_11 = arith.constant 0 : index
    %c0_12 = arith.constant 0 : index
    %12 = vector.load %arg4[%c0_11, %c0_12] : memref<2x16xf32, #tpu.memory_space<vmem>>, vector<2x16xf32>
    %cst_13 = arith.constant dense<0.000000e+00> : vector<2x16xf32>
    %13 = tpu.matmul %11, %12, %cst_13 {dimension_numbers = #tpu.dot_dimension_numbers<[1], [0], [0], [1], [0, 0, 1, 1], [], []>} : vector<2x2xf32>, vector<2x16xf32>, vector<2x16xf32> -> vector<2x16xf32>
    %14 = arith.negf %13 : vector<2x16xf32>
    %15 = math.exp %14 : vector<2x16xf32>
    %cst_14 = arith.constant 1.000000e+00 : f32
    %16 = vector.broadcast %cst_14 : f32 to vector<2x16xf32>
    %17 = arith.addf %16, %15 : vector<2x16xf32>
    %18 = arith.divf %16, %17 : vector<2x16xf32>
    %19 = vector.shape_cast %18 : vector<2x16xf32> to vector<2x16x1xf32>
    %20 = vector.broadcast %19 : vector<2x16x1xf32> to vector<2x16x64xf32>
    %21 = arith.mulf %0, %20 : vector<2x16x64xf32>
    %c0_15 = arith.constant 0 : index
    %c0_16 = arith.constant 0 : index
    %c0_17 = arith.constant 0 : index
    %22 = vector.load %arg5[%c0_15, %c0_16, %c0_17] : memref<2x16x64xf32, #tpu.memory_space<vmem>>, vector<2x16x64xf32>
    tpu.vector_store %arg5[%c0_15, %c0_16, %c0_17], %21 {strides = array<i32>} : memref<2x16x64xf32, #tpu.memory_space<vmem>>, vector<2x16x64xf32>,
    return
  }
  func.func @transform_0(%arg0: i32) -> (i32, i32, i32) {
    %c0_i32 = arith.constant 0 : i32
    %c0_i32_0 = arith.constant 0 : i32
    %c0_i32_1 = arith.constant 0 : i32
    return %arg0, %c0_i32, %c0_i32_0 : i32, i32, i32
  }
  func.func @transform_1(%arg0: i32) -> (i32, i32) {
    %c0_i32 = arith.constant 0 : i32
    %c0_i32_0 = arith.constant 0 : i32
    %c0_i32_1 = arith.constant 0 : i32
    return %c0_i32, %c0_i32_0 : i32, i32
  }
  func.func @transform_2(%arg0: i32) -> (i32, i32) {
    %c0_i32 = arith.constant 0 : i32
    %c0_i32_0 = arith.constant 0 : i32
    %c0_i32_1 = arith.constant 0 : i32
    return %c0_i32, %c0_i32_0 : i32, i32
  }
  func.func @transform_3(%arg0: i32) -> (i32, i32) {
    %c0_i32 = arith.constant 0 : i32
    %c0_i32_0 = arith.constant 0 : i32
    %c0_i32_1 = arith.constant 0 : i32
    return %c0_i32, %c0_i32_0 : i32, i32
  }
  func.func @transform_4(%arg0: i32) -> (i32, i32, i32) {
    %c0_i32 = arith.constant 0 : i32
    %c0_i32_0 = arith.constant 0 : i32
    %c0_i32_1 = arith.constant 0 : i32
    return %arg0, %c0_i32, %c0_i32_0 : i32, i32, i32
  }
}

</mosaic_0001>

<bundles_post_ra>
// kernel: tpu_custom_call.1
= control target key start
LH: loop header
LB: loop body
LE: loop exit
PB: predicated region body
PF: predicated region fallthrough
CT: control target
= control target key end

     0   :  { %vm22_vm0 = vcmask 523264   ;;  %s570_s0 = inlined_call_operand.vmem [shape: f32[2,16,64], index: 0, kind: input, shape index: {}]   ;;  %s571_s1 = inlined_call_operand.vmem [shape: f32[16,2], index: 1, kind: input, shape index: {}]   ;;  %s572_s2 = inlined_call_operand.vmem [shape: f32[16,2], index: 2, kind: input, shape index: {}]   ;;  %s573_s3 = inlined_call_operand.vmem [shape: f32[2,16], index: 3, kind: input, shape index: {}]   ;;  %s574_s4 = inlined_call_operand.hbm [shape: f32[2,16,64], index: 4, kind: output, shape index: {}]  }
   0x1   :  { %v491_v0 = vld [vmem:[%s570_s0 + $0x10] sm:$0xff]  ;;  %v496_v1 = vld [vmem:[%s570_s0] sm:$0xff]  ;;  %v501_v2 = vld [vmem:[%s570_s0 + $0x18] sm:$0xff] }
   0x2   :  { %v45_v3 = vsel %vm22_vm0, %v491_v0, -inf  ;;  %v39_v4 = vsel %vm22_vm0, %v496_v1, -inf  ;;  %v510_v5 = vld [vmem:[%s570_s0 + $0x8] sm:$0xff] }
   0x3   :  { %46 = vmax.xlane.f32.xlu1 %v45_v3  ;;  %40 = vmax.xlane.f32.xlu0 %v39_v4 }
   0x4   :  { %9 = vsyncpa [#allocation3], 0  ;;  %v48_v6 = vsel %vm22_vm0, %v501_v2, -inf  ;;  %v42_v7 = vsel %vm22_vm0, %v510_v5, -inf  ;;  %v26_v8 = vsel %vm22_vm0, %v510_v5, 0.0  ;;  %v23_v9 = vsel %vm22_vm0, %v496_v1, 0.0 }
   0x5   :  { %v32_v10 = vsel %vm22_vm0, %v501_v2, 0.0  ;;  %v29_v11 = vsel %vm22_vm0, %v491_v0, 0.0  ;;  %v53_v12 = vld [vmem:[%s572_s2] sm:$0xff]  ;;  %v54_v13 = vld [vmem:[%s572_s2 + $0x8] sm:$0xff]  ;;  %v457_v15 = vmov 0.0|0.0   ;;  %vm458_vm1 = vmmov 0  }
   0x6   :  { %v416_v14 = vpack.c.bf16 %v54_v13, %v53_v12  ;;  %415 = vmatprep.subr.bf16.mxu0 %v457_v15  ;;  %v459_v16 = vmov 0.0   ;;  %v59_v17 = vlaneseq  ;;  %v51_v25 = vld [vmem:[%s571_s1] sm:$0xff]  ;;  %v52_v26 = vld [vmem:[%s571_s1 + $0x8] sm:$0xff]  ;;  %vm70_vm2 = vcmask 130112  }
   0x7   :  { %49 = vmax.xlane.f32.xlu1 %v48_v6  ;;  %43 = vmax.xlane.f32.xlu0 %v42_v7  ;;  %vm81_vm3 = vcmask 1041409   ;;  %vm83_vm4 = vcmask 130048   ;;  %v419_v33 = vpack.c.bf16 %v52_v26, %v51_v25  ;;  %v252_v52 = vld [vmem:[%s573_s3] sm:$0x3]  ;;  %vm257_vm5 = vcmask 1041408   ;;  %s460_s3 = smov [#allocation2]  }
   0x8   :  { %417 = vmatpush3.bf16.msra.mxu0 %v416_v14  ;;  %400 = vmatprep.mubr.msk.f32.mxu0 %vm458_vm1, %v459_v16  ;;  %v60_v18 = vand.u32 127, %v59_v17  ;;  %v62_v19 = vshrl.u32 %v59_v17, 7  ;;  %vm253_vm6 = vcmask 15360   ;;  %s372_s30 = sshll.u32 %s460_s3, 4  ;;  %s373_s30 = int_to_ptr.vmem [resolvable:$true] %s372_s30 }
   0x9   :  { %418 = vmatprep.subr.bf16.mxu0 %v457_v15  ;;  %410 = vmatprep.subr.mxu1 %v459_v16  ;;  %s433_s5 = scalar_lea.vmem %s373_s30, 512  ;;  %p438_p1 = scmp.lt.s32.totalorder %s373_s30, %s373_s30 }
   0xa   :  { %412 = vmatprep.mubr.msk.f32.mxu1 %vm458_vm1, %v459_v16  ;;  %v65_v20 = vadd.s32 4294967288, %v60_v18  ;;  %v63_v23 = vsub.s32 %v60_v18, %v62_v19  ;;  %411 = vmatpush3.msk.msra.mxu1 %vm257_vm5, %v252_v52  ;;  %v339_v61 = vsub.s32 0, %v62_v19  ;;  %v350_v3 = vsub.s32 1, %v62_v19  ;;  %p434_p0 = scmp.ne.s32.totalorder %s373_s30, %s433_s5  ;;  %p439_p2 = scmp.lt.s32.totalorder %s433_s5, %s433_s5 }
   0xb   :  { %27 = vadd.xlane.f32.xlu1 %v26_v8  ;;  %24 = vadd.xlane.f32.xlu0 %v23_v9 }
   0xc   :  { %v68_v24 = vsub.s32 %v65_v20, %v62_v19  ;;  %p440_p3 = por %p439_p2, %p438_p1 }
   0xe   :  { %p441_p4 = pnand %p440_p3, %p434_p0 }
   0xf   :  { %33 = vadd.xlane.f32.xlu1 %v32_v10  ;;  %30 = vadd.xlane.f32.xlu0 %v29_v11 }
  0x90   :  { %v47_v21 = vpop.xlane.xlu1 %46  ;;  %v41_v22 = vpop.xlane.xlu0 %40 }
  0x91   :  { %v75_v29 = vrot.slane %v47_v21, %v63_v23  ;;  %v64_v30 = vrot.slane %v41_v22, %v63_v23 }
  0x94   :  { %v50_v27 = vpop.xlane.xlu1 %49  ;;  %v44_v28 = vpop.xlane.xlu0 %43 }
  0x95   :  { %v79_v31 = vrot.slane %v50_v27, %v68_v24  ;;  %v69_v32 = vrot.slane %v44_v28, %v68_v24 }
  0x97   :  { %v80_v34 = vsel %vm70_vm2, %v79_v31, %v75_v29  ;;  %v71_v35 = vsel %vm70_vm2, %v69_v32, %v64_v30 }
  0x98   :  { %v28_v36 = vpop.xlane.xlu1 %27  ;;  %v25_v37 = vpop.xlane.xlu0 %24  ;;  %v82_v38 = vsel %vm81_vm3, %v80_v34, %v71_v35 }
  0x99   :  { %v36_v39 = vmul.f32 0.015625, %v28_v36  ;;  %v35_v40 = vmul.f32 0.015625, %v25_v37  ;;  %401 = vmatmul.mubr.msk.f32.vlgmr.msra.gmra.mrb[0].mxu0 %vm83_vm4, %v82_v38 }
  0x9a   :  { %420 = vmatpush3.bf16.msra.mxu0 %v419_v33  ;;  %407 = vmatprep.mubr.msk.f32.mxu0 %vm458_vm1, %v459_v16 }
  0x9b   :  { %v167_v43 = vrot.slane %v36_v39, %v68_v24  ;;  %v163_v44 = vrot.slane %v35_v40, %v63_v23 }
  0x9c   :  { %v34_v41 = vpop.xlane.xlu1 %33  ;;  %v31_v42 = vpop.xlane.xlu0 %30 }
  0x9d   :  { %v38_v45 = vmul.f32 0.015625, %v34_v41  ;;  %v37_v46 = vmul.f32 0.015625, %v31_v42  ;;  %v168_v49 = vsel %vm70_vm2, %v167_v43, %v163_v44 }
  0x9f   :  { %v176_v47 = vrot.slane %v38_v45, %v68_v24  ;;  %v172_v48 = vrot.slane %v37_v46, %v63_v23 }
  0xa1   :  { %v177_v50 = vsel %vm70_vm2, %v176_v47, %v172_v48 }
  0xa2   :  { %v178_v51 = vsel %vm81_vm3, %v177_v50, %v168_v49 }
  0xa3   :  { %408 = vmatmul.mubr.msk.f32.vlgmr.msra.gmra.mrb[0].mxu0 %vm83_vm4, %v178_v51 }
 0x176   :  { %v247_v53 = vpop.f32.mrb[0].mxu0 }
 0x177   :  { %v251_v54 = vmax.f32 %v247_v53, 0.0  ;;  %v409_v55 = vpop.f32.mrb[1].mxu0 }
 0x179   :  { %413 = vmatmul.mubr.msk.f32.vlgmr.msra.gmra.mrb[0].mxu1 %vm253_vm6, %v251_v54 }
 0x24c   :  { %v327_v56 = vpop.f32.mrb[0].mxu1 }
 0x24d   :  { %v387_v57 = vmul.f32 -1.442695, %v327_v56  ;;  %v414_v58 = vpop.f32.mrb[1].mxu1 }
 0x24f   :  { %429 = vpow2.f32 %v387_v57 }
 0x259   :  { %v430_v59 = vpop.eup %429 }
 0x25a   :  { %v334_v60 = vadd.f32 1.0, %v430_v59 }
 0x25c   :  { %431 = vrcp.f32 %v334_v60 }
 0x266   :  { %v432_v62 = vpop.eup %431 }
 0x267   :  { %v340_v63 = vrot.slane %v432_v62, %v339_v61  ;;  %v351_v4 = vrot.slane %v432_v62, %v350_v3 }
 0x269   :  { %346 = vbcast.lane.b32.xlu1 %v340_v63, 264  ;;  %342 = vbcast.lane.b32.xlu0 %v340_v63, 256 }
 0x26d   :  { %353 = vbcast.lane.b32.xlu1 %v351_v4, 256 }
 0x271   :  { %357 = vbcast.lane.b32.xlu1 %v351_v4, 264 }
 0x2db   :  { %v347_v6 = vpop.permute.xlu1 %346  ;;  %v343_v7 = vpop.permute.xlu0 %342 }
 0x2dc   :  { %v360_v8 = vmul.f32 %v347_v6, %v510_v5  ;;  %v359_v9 = vmul.f32 %v343_v7, %v496_v1 }
 0x2de   :  { %364 = vst.msk [vmem:[#allocation2 + $0x8] sm:$0xff] %vm22_vm0, %v360_v8  ;;  %363 = vst.msk [vmem:[#allocation2] sm:$0xff] %vm22_vm0, %v359_v9 }
 0x2df   :  { %v354_v10 = vpop.permute.xlu1 %353 }
 0x2e0   :  { %v361_v11 = vmul.f32 %v354_v10, %v491_v0 }
 0x2e2   :  { %365 = vst.msk [vmem:[#allocation2 + $0x10] sm:$0xff] %vm22_vm0, %v361_v11 }
 0x2e3   :  { %v358_v12 = vpop.permute.xlu1 %357 }
 0x2e4   :  { %v362_v13 = vmul.f32 %v358_v12, %v501_v2 }
 0x2e6   :  { %366 = vst.msk [vmem:[#allocation2 + $0x18] sm:$0xff] %vm22_vm0, %v362_v13 }
 0x2e7   :  { %444 = shalt.err (!%p441_p4)
}
 0x2e8   :  { %s445_s8 = scalar_lea.hbm %s574_s4, 512 }
 0x2e9   :  { %p446_p5 = scmp.ne.s32.totalorder %s574_s4, %s445_s8  ;;  %p449_p6 = scmp.lt.u32.totalorder %s445_s8, %s574_s4 }
 0x2eb   :  { %p451_p7 = pnand %p449_p6, %p446_p5 }
 0x2ed   :  { %454 = shalt.err (!%p451_p7)
}
 0x2ee   :  { %s461_s13 = smov 128   ;;  %s462_s14 = smov 8  }
 0x2ef   :  { %378 = dma.vmem_to_hbm [thread:$0]  %s373_s30, 512, %s574_s4, [#allocation3], %s461_s13, %s461_s13, %s462_s14  }
 0x2f0   :  { %455 = dma.done.wait [#allocation3], 512  }
 0x2f1   :  { %456 = vsyncadd [#allocation3], 4294966784 }
 0x2f2   :  { %382 = vsyncpa [#allocation3], 1 }

</bundles_post_ra>
